<compile_context>
chip_gen: v6e
topology: v6e:2x2x1
jax: 0.10.0
libtpu: 0.0.40
codegen_flags: <defaults>
</compile_context>

<pallas_src>
import math

import jax
import jax.numpy as jnp
import numpy as np
from jax.experimental import pallas as pl
from jax.experimental.pallas import tpu as pltpu


def _hgc_kernel(x_ref, w_ref,
                jadj_ref, padj_ref, sadj_ref,
                jatt_ref, patt_ref, satt_ref, gatt_ref,
                b_ref, o_ref):
    # x_ref : (1, N, F)  one batch element
    # w_ref : (F, F)     weight (in_features, out_features) -- used as-is, no transpose
    # *adj  : (N, N)     fixed hypergraph masks (VMEM-resident)
    # *att  : (N, N)     learned attention parameters (VMEM-resident)
    # b_ref : (1, F)     bias row
    # o_ref : (1, N, F)
    x = x_ref[0]                                                    # (N, F)

    # support = x @ W on the MXU with f32 accumulation.
    support = jnp.dot(x, w_ref[...], preferred_element_type=jnp.float32)

    # dynamic attention: pure VPU elementwise on VMEM-resident operands.
    att = (jadj_ref[...] * jatt_ref[...]
           + padj_ref[...] * patt_ref[...]
           + sadj_ref[...] * satt_ref[...]
           + gatt_ref[...])

    # output = dynamic_att @ support on the MXU with f32 accumulation.
    out = jnp.dot(att, support, preferred_element_type=jnp.float32)

    # residual + bias, cast back to the output dtype.
    o_ref[0] = (x.astype(jnp.float32) + out + b_ref[...]).astype(o_ref.dtype)


@jax.jit
def hypergraph_convolution(x, weight, bias,
                           joint_adj, part_adj, pose_adj,
                           joint_att, part_att, pose_att, global_att):
    """HyperGraphConvolution forward.  x: (..., N, F) -> (..., N, F)."""
    n = x.shape[-2]
    f = x.shape[-1]
    assert weight.shape == (f, f), "residual connection requires in_features == out_features"
    lead = x.shape[:-2]
    b = 1
    for s in lead:
        b *= s

    x3d = x.reshape(b, n, f)
    bias2d = bias.reshape(1, f)

    itemsize = jnp.dtype(x.dtype).itemsize
    cost = pl.CostEstimate(
        flops=2 * b * (n * f * f + n * n * f) + b * 10 * n * n,
        transcendentals=0,
        bytes_accessed=(2 * b * n * f + f * f + 7 * n * n + f) * itemsize,
    )

    att_spec = pl.BlockSpec((n, n), lambda i: (0, 0))               # resident every step

    out = pl.pallas_call(
        _hgc_kernel,
        out_shape=jax.ShapeDtypeStruct((b, n, f), x.dtype),
        grid_spec=pltpu.PrefetchScalarGridSpec(
            num_scalar_prefetch=0,
            grid=(b,),
            in_specs=[
                pl.BlockSpec((1, n, f), lambda i: (i, 0, 0)),       # x, tiled over batch
                pl.BlockSpec((f, f), lambda i: (0, 0)),             # weight, resident
                att_spec, att_spec, att_spec,                       # joint/part/pose masks
                att_spec, att_spec, att_spec, att_spec,             # joint/part/pose/global att
                pl.BlockSpec((1, f), lambda i: (0, 0)),             # bias row, resident
            ],
            out_specs=pl.BlockSpec((1, n, f), lambda i: (i, 0, 0)),
        ),
        compiler_params=pltpu.CompilerParams(
            dimension_semantics=("parallel",),
        ),
        cost_estimate=cost,
    )(x3d, weight, joint_adj, part_adj, pose_adj,
      joint_att, part_att, pose_att, global_att, bias2d)

    return out.reshape(*lead, n, f)


def _reference(x, weight, bias, jadj, padj, sadj, jatt, patt, satt, gatt):
    support = jnp.einsum("...nf,fo->...no", x, weight)
    att = jadj * jatt + padj * patt + sadj * satt + gatt
    out = jnp.einsum("mn,...no->...mo", att, support)
    return x + out + bias


if __name__ == "__main__":
    NODE_N_BASE = 16            # cur_used_dataset.node_n
    N = NODE_N_BASE * 3         # node_n used by the module (3D coords per joint)
    F = 32                      # in_features == out_features
    B = 2                       # batch

    # Deterministic hyper-edge sets standing in for cur_used_dataset.*_level_edge.
    joint_edges = [[i, i + 1] for i in range(NODE_N_BASE - 1)]
    part_edges = [[4 * g + k for k in range(4)] for g in range(NODE_N_BASE // 4)]
    pose_edges = [list(range(NODE_N_BASE))]

    def adj_from_edges(edges):   # mirrors obtain_hypergraph_mask
        a = np.zeros((NODE_N_BASE, NODE_N_BASE), dtype=np.float32)
        for item in edges:
            for i in item:
                for j in item:
                    a[j, i] = 1.0
                    a[i, j] = 1.0
        return a

    def expand_3d(a):            # mirrors obtain_hypergraph_mask_3d (3x3 block expansion)
        return np.kron(a, np.ones((3, 3), dtype=np.float32))

    joint_adj = jnp.asarray(expand_3d(adj_from_edges(joint_edges)))
    part_adj = jnp.asarray(expand_3d(adj_from_edges(part_edges)))
    pose_adj = jnp.asarray(expand_3d(adj_from_edges(pose_edges)))

    key = jax.random.PRNGKey(0)
    kx, kw, kja, kpa, ksa, kga, kb = jax.random.split(key, 7)

    stdv = 1.0 / math.sqrt(F)    # reset_parameters(): uniform(-stdv, stdv)
    weight = jax.random.uniform(kw, (F, F), jnp.float32, -stdv, stdv)
    joint_att = jax.random.uniform(kja, (N, N), jnp.float32, -stdv, stdv)
    part_att = jax.random.uniform(kpa, (N, N), jnp.float32, -stdv, stdv)
    pose_att = jax.random.uniform(ksa, (N, N), jnp.float32, -stdv, stdv)
    global_att = jax.random.uniform(kga, (N, N), jnp.float32, -stdv, stdv)
    bias = jax.random.uniform(kb, (F,), jnp.float32, -stdv, stdv)

    x = jax.random.normal(kx, (B, N, F), jnp.float32)

    y = hypergraph_convolution(x, weight, bias,
                               joint_adj, part_adj, pose_adj,
                               joint_att, part_att, pose_att, global_att)
    y = jax.block_until_ready(y)

    y_ref = _reference(x, weight, bias, joint_adj, part_adj, pose_adj,
                       joint_att, part_att, pose_att, global_att)

    assert y.shape == (B, N, F)
    assert jnp.allclose(y, y_ref, atol=2e-4, rtol=2e-4), "mismatch vs reference"

    print("KERNEL_OK")
</pallas_src>

<mosaic_0001>
module attributes {stable_mosaic.version = 11 : i64} {
  func.func @_hgc_kernel(%arg0: i32, %arg1: memref<1x48x32xf32, #tpu.memory_space<vmem>>, %arg2: memref<32x32xf32, #tpu.memory_space<vmem>>, %arg3: memref<48x48xf32, #tpu.memory_space<vmem>>, %arg4: memref<48x48xf32, #tpu.memory_space<vmem>>, %arg5: memref<48x48xf32, #tpu.memory_space<vmem>>, %arg6: memref<48x48xf32, #tpu.memory_space<vmem>>, %arg7: memref<48x48xf32, #tpu.memory_space<vmem>>, %arg8: memref<48x48xf32, #tpu.memory_space<vmem>>, %arg9: memref<48x48xf32, #tpu.memory_space<vmem>>, %arg10: memref<1x32xf32, #tpu.memory_space<vmem>>, %arg11: memref<1x48x32xf32, #tpu.memory_space<vmem>>) attributes {dimension_semantics = [#tpu.dimension_semantics<parallel>], iteration_bounds = array<i64: 2>, scalar_prefetch = 0 : i64, scratch_operands = 0 : i64, tpu.core_type = #tpu.core_type<tc>, window_params = [{transform_indices = @transform_0, window_bounds = array<i64: 1, 48, 32>}, {pipeline_mode = #tpu.pipeline_mode<synchronous>, transform_indices = @transform_1, window_bounds = array<i64: 32, 32>}, {pipeline_mode = #tpu.pipeline_mode<synchronous>, transform_indices = @transform_2, window_bounds = array<i64: 48, 48>}, {pipeline_mode = #tpu.pipeline_mode<synchronous>, transform_indices = @transform_3, window_bounds = array<i64: 48, 48>}, {pipeline_mode = #tpu.pipeline_mode<synchronous>, transform_indices = @transform_4, window_bounds = array<i64: 48, 48>}, {pipeline_mode = #tpu.pipeline_mode<synchronous>, transform_indices = @transform_5, window_bounds = array<i64: 48, 48>}, {pipeline_mode = #tpu.pipeline_mode<synchronous>, transform_indices = @transform_6, window_bounds = array<i64: 48, 48>}, {pipeline_mode = #tpu.pipeline_mode<synchronous>, transform_indices = @transform_7, window_bounds = array<i64: 48, 48>}, {pipeline_mode = #tpu.pipeline_mode<synchronous>, transform_indices = @transform_8, window_bounds = array<i64: 48, 48>}, {pipeline_mode = #tpu.pipeline_mode<synchronous>, transform_indices = @transform_9, window_bounds = array<i64: 1, 32>}, {transform_indices = @transform_10, window_bounds = array<i64: 1, 48, 32>}]} {
    %c0 = arith.constant 0 : index
    %c0_0 = arith.constant 0 : index
    %c0_1 = arith.constant 0 : index
    %0 = vector.load %arg1[%c0, %c0_0, %c0_1] : memref<1x48x32xf32, #tpu.memory_space<vmem>>, vector<1x48x32xf32>
    %1 = vector.shape_cast %0 : vector<1x48x32xf32> to vector<48x32xf32>
    %c0_2 = arith.constant 0 : index
    %c0_3 = arith.constant 0 : index
    %2 = vector.load %arg2[%c0_2, %c0_3] : memref<32x32xf32, #tpu.memory_space<vmem>>, vector<32x32xf32>
    %cst = arith.constant dense<0.000000e+00> : vector<48x32xf32>
    %3 = tpu.matmul %1, %2, %cst {dimension_numbers = #tpu.dot_dimension_numbers<[1], [0], [0], [1], [0, 0, 1, 1], [], []>} : vector<48x32xf32>, vector<32x32xf32>, vector<48x32xf32> -> vector<48x32xf32>
    %c0_4 = arith.constant 0 : index
    %c0_5 = arith.constant 0 : index
    %4 = vector.load %arg3[%c0_4, %c0_5] : memref<48x48xf32, #tpu.memory_space<vmem>>, vector<48x48xf32>
    %c0_6 = arith.constant 0 : index
    %c0_7 = arith.constant 0 : index
    %5 = vector.load %arg6[%c0_6, %c0_7] : memref<48x48xf32, #tpu.memory_space<vmem>>, vector<48x48xf32>
    %6 = arith.mulf %4, %5 : vector<48x48xf32>
    %c0_8 = arith.constant 0 : index
    %c0_9 = arith.constant 0 : index
    %7 = vector.load %arg4[%c0_8, %c0_9] : memref<48x48xf32, #tpu.memory_space<vmem>>, vector<48x48xf32>
    %c0_10 = arith.constant 0 : index
    %c0_11 = arith.constant 0 : index
    %8 = vector.load %arg7[%c0_10, %c0_11] : memref<48x48xf32, #tpu.memory_space<vmem>>, vector<48x48xf32>
    %9 = arith.mulf %7, %8 : vector<48x48xf32>
    %10 = arith.addf %6, %9 : vector<48x48xf32>
    %c0_12 = arith.constant 0 : index
    %c0_13 = arith.constant 0 : index
    %11 = vector.load %arg5[%c0_12, %c0_13] : memref<48x48xf32, #tpu.memory_space<vmem>>, vector<48x48xf32>
    %c0_14 = arith.constant 0 : index
    %c0_15 = arith.constant 0 : index
    %12 = vector.load %arg8[%c0_14, %c0_15] : memref<48x48xf32, #tpu.memory_space<vmem>>, vector<48x48xf32>
    %13 = arith.mulf %11, %12 : vector<48x48xf32>
    %14 = arith.addf %10, %13 : vector<48x48xf32>
    %c0_16 = arith.constant 0 : index
    %c0_17 = arith.constant 0 : index
    %15 = vector.load %arg9[%c0_16, %c0_17] : memref<48x48xf32, #tpu.memory_space<vmem>>, vector<48x48xf32>
    %16 = arith.addf %14, %15 : vector<48x48xf32>
    %cst_18 = arith.constant dense<0.000000e+00> : vector<48x32xf32>
    %17 = tpu.matmul %16, %3, %cst_18 {dimension_numbers = #tpu.dot_dimension_numbers<[1], [0], [0], [1], [0, 0, 1, 1], [], []>} : vector<48x48xf32>, vector<48x32xf32>, vector<48x32xf32> -> vector<48x32xf32>
    %18 = arith.addf %1, %17 : vector<48x32xf32>
    %c0_19 = arith.constant 0 : index
    %c0_20 = arith.constant 0 : index
    %19 = vector.load %arg10[%c0_19, %c0_20] : memref<1x32xf32, #tpu.memory_space<vmem>>, vector<1x32xf32>
    %20 = vector.broadcast %19 : vector<1x32xf32> to vector<48x32xf32>
    %21 = arith.addf %18, %20 : vector<48x32xf32>
    %c0_21 = arith.constant 0 : index
    %c0_22 = arith.constant 0 : index
    %c0_23 = arith.constant 0 : index
    %22 = vector.load %arg11[%c0_21, %c0_22, %c0_23] : memref<1x48x32xf32, #tpu.memory_space<vmem>>, vector<1x48x32xf32>
    %23 = vector.shape_cast %22 : vector<1x48x32xf32> to vector<48x32xf32>
    %24 = vector.shape_cast %21 : vector<48x32xf32> to vector<1x48x32xf32>
    tpu.vector_store %arg11[%c0_21, %c0_22, %c0_23], %24 {strides = array<i32>} : memref<1x48x32xf32, #tpu.memory_space<vmem>>, vector<1x48x32xf32>,
    return
  }
  func.func @transform_0(%arg0: i32) -> (i32, i32, i32) {
    %c0_i32 = arith.constant 0 : i32
    %c0_i32_0 = arith.constant 0 : i32
    %c0_i32_1 = arith.constant 0 : i32
    return %arg0, %c0_i32, %c0_i32_0 : i32, i32, i32
  }
  func.func @transform_1(%arg0: i32) -> (i32, i32) {
    %c0_i32 = arith.constant 0 : i32
    %c0_i32_0 = arith.constant 0 : i32
    %c0_i32_1 = arith.constant 0 : i32
    return %c0_i32, %c0_i32_0 : i32, i32
  }
  func.func @transform_2(%arg0: i32) -> (i32, i32) {
    %c0_i32 = arith.constant 0 : i32
    %c0_i32_0 = arith.constant 0 : i32
    %c0_i32_1 = arith.constant 0 : i32
    return %c0_i32, %c0_i32_0 : i32, i32
  }
  func.func @transform_3(%arg0: i32) -> (i32, i32) {
    %c0_i32 = arith.constant 0 : i32
    %c0_i32_0 = arith.constant 0 : i32
    %c0_i32_1 = arith.constant 0 : i32
    return %c0_i32, %c0_i32_0 : i32, i32
  }
  func.func @transform_4(%arg0: i32) -> (i32, i32) {
    %c0_i32 = arith.constant 0 : i32
    %c0_i32_0 = arith.constant 0 : i32
    %c0_i32_1 = arith.constant 0 : i32
    return %c0_i32, %c0_i32_0 : i32, i32
  }
  func.func @transform_5(%arg0: i32) -> (i32, i32) {
    %c0_i32 = arith.constant 0 : i32
    %c0_i32_0 = arith.constant 0 : i32
    %c0_i32_1 = arith.constant 0 : i32
    return %c0_i32, %c0_i32_0 : i32, i32
  }
  func.func @transform_6(%arg0: i32) -> (i32, i32) {
    %c0_i32 = arith.constant 0 : i32
    %c0_i32_0 = arith.constant 0 : i32
    %c0_i32_1 = arith.constant 0 : i32
    return %c0_i32, %c0_i32_0 : i32, i32
  }
  func.func @transform_7(%arg0: i32) -> (i32, i32) {
    %c0_i32 = arith.constant 0 : i32
    %c0_i32_0 = arith.constant 0 : i32
    %c0_i32_1 = arith.constant 0 : i32
    return %c0_i32, %c0_i32_0 : i32, i32
  }
  func.func @transform_8(%arg0: i32) -> (i32, i32) {
    %c0_i32 = arith.constant 0 : i32
    %c0_i32_0 = arith.constant 0 : i32
    %c0_i32_1 = arith.constant 0 : i32
    return %c0_i32, %c0_i32_0 : i32, i32
  }
  func.func @transform_9(%arg0: i32) -> (i32, i32) {
    %c0_i32 = arith.constant 0 : i32
    %c0_i32_0 = arith.constant 0 : i32
    %c0_i32_1 = arith.constant 0 : i32
    return %c0_i32, %c0_i32_0 : i32, i32
  }
  func.func @transform_10(%arg0: i32) -> (i32, i32, i32) {
    %c0_i32 = arith.constant 0 : i32
    %c0_i32_0 = arith.constant 0 : i32
    %c0_i32_1 = arith.constant 0 : i32
    return %arg0, %c0_i32, %c0_i32_0 : i32, i32, i32
  }
}

</mosaic_0001>

<bundles_post_ra>
// kernel: hypergraph_convolution.1
= control target key start
LH: loop header
LB: loop body
LE: loop exit
PB: predicated region body
PF: predicated region fallthrough
CT: control target
= control target key end

     0   :  { %15 = vsyncpa [#allocation3], 0  ;;  %s1480_s0 = inlined_call_operand.vmem [shape: f32[2,48,32], index: 0, kind: input, shape index: {}]   ;;  %s1481_s1 = inlined_call_operand.hbm [shape: f32[32,32], index: 1, kind: input, shape index: {}]   ;;  %s1482_s2 = inlined_call_operand.vmem [shape: f32[48,48], index: 2, kind: input, shape index: {}]   ;;  %s1483_s3 = inlined_call_operand.vmem [shape: f32[48,48], index: 3, kind: input, shape index: {}]   ;;  %s1484_s4 = inlined_call_operand.vmem [shape: f32[48,48], index: 4, kind: input, shape index: {}]   ;;  %s1485_s5 = inlined_call_operand.hbm [shape: f32[48,48], index: 5, kind: input, shape index: {}]   ;;  %s1486_s6 = inlined_call_operand.hbm [shape: f32[48,48], index: 6, kind: input, shape index: {}]   ;;  %s1487_s7 = inlined_call_operand.hbm [shape: f32[48,48], index: 7, kind: input, shape index: {}]   ;;  %s1488_s8 = inlined_call_operand.hbm [shape: f32[48,48], index: 8, kind: input, shape index: {}]   ;;  %s1489_s9 = inlined_call_operand.vmem [shape: f32[1,32], index: 9, kind: input, shape index: {}]   ;;  %s1490_s10 = inlined_call_operand.vmem [shape: f32[2,48,32], index: 10, kind: output, shape index: {}]  }
   0x1   :  { %16 = vsyncpa [#allocation5], 0 }
   0x2   :  { %17 = vsyncpa [#allocation8], 0  ;;  %s1245_s13 = smov 0  }
   0x3 LB: > { %s1251_s14 = sadd.s32 4294967295, %s1181_s13   ;;  %p881_p0 = scmp.ge.s32.totalorder %s1181_s13, 1  ;;  %s1181_s13 = sphi %s1245_s13, %s23_s13  }
   0x4   : > { %p269_p1 = scmp.lt.s32.totalorder %s1181_s13, 3  ;;  %p1008_p2 = scmp.eq.s32.totalorder %s1251_s14, 0 }
   0x5   : > { %s1183_s16 = smov [#allocation4]   ;;  %s1184_s18 = smov [#allocation7]  }
   0x6   : > { %p1256_p3 = pnand %p881_p0, %p269_p1  ;;  %s303_s17 = sshll.u32 %s1183_s16, 4  ;;  %s304_s17 = int_to_ptr.vmem [resolvable:$true] %s303_s17 }
   0x7   : > { %s329_s19 = sshll.u32 %s1184_s18, 4  ;;  %s1185_s21 = smov [#allocation2]   ;;  %s1262_s19 = int_to_ptr.vmem [resolvable:$true] %s329_s19 }
   0x8   : > { %p992_p4 = pneg %p1256_p3  ;;  %s281_s22 = sshll.u32 %s1185_s21, 4  ;;  %s1270_s22 = int_to_ptr.vmem [resolvable:$true] %s281_s22 }
   0x9   : > { %s1186_s23 = smov [#allocation6]   ;;  %s1044_s26 = scalar_lea.vmem %s304_s17, 768 }
   0xa   : > { %p1266_p5 = pnand %p1008_p2, %p992_p4  ;;  %s1272_s24 = sshll.u32 %s1186_s23, 4  ;;  %s317_s24 = int_to_ptr.vmem [resolvable:$true] %s1272_s24 }
   0xb   : > { %p1045_p7 = scmp.ne.s32.totalorder %s304_s17, %s1044_s26  ;;  %p1052_p10 = scmp.lt.s32.totalorder %s304_s17, %s304_s17 }
   0xc   : > { %p1276_p6 = pneg %p1266_p5  ;;  %p1053_p11 = scmp.lt.s32.totalorder %s1044_s26, %s1044_s26 }
   0xe   : > { %p1047_p8 = pnand %p1045_p7, %p1276_p6  ;;  %p1054_p12 = por %p1053_p11, %p1052_p10 }
  0x10   : > { %p1048_p9 = pneg %p1047_p8 }
  0x12   : > { %p1055_p13 = pnand %p1054_p12, %p1048_p9 }
  0x14   : > { %1058 = shalt.err (!%p1055_p13)
}
  0x15   : > { %s1187_s27 = smov 128   ;;  %s1188_s28 = smov 8  }
  0x16   : > { %998 = dma.hbm_to_vmem [thread:$0]  (!%p1266_p5), %s1485_s5, 768, %s304_s17, [#allocation5], %s1187_s27, %s1187_s27, %s1188_s28  }
  0x17   : > { %s1070_s11 = scalar_lea.vmem %s1262_s19, 768  ;;  %p1078_p7 = scmp.lt.s32.totalorder %s1262_s19, %s1262_s19 }
  0x18   : > { %p1071_p0 = scmp.ne.s32.totalorder %s1262_s19, %s1070_s11  ;;  %p1079_p8 = scmp.lt.s32.totalorder %s1070_s11, %s1070_s11 }
  0x1a   : > { %p1073_p1 = pnand %p1071_p0, %p1276_p6  ;;  %p1080_p9 = por %p1079_p8, %p1078_p7 }
  0x1c   : > { %p1074_p4 = pneg %p1073_p1 }
  0x1e   : > { %p1081_p10 = pnand %p1080_p9, %p1074_p4 }
  0x20   : > { %1084 = shalt.err (!%p1081_p10)
}
  0x21   : > { %1004 = dma.hbm_to_vmem [thread:$0]  (!%p1266_p5), %s1487_s7, 768, %s1262_s19, [#allocation8], %s1187_s27, %s1187_s27, %s1188_s28  }
  0x22   : > { %s1096_s17 = scalar_lea.vmem %s1270_s22, 512  ;;  %p1104_p0 = scmp.lt.s32.totalorder %s1270_s22, %s1270_s22 }
  0x23   : > { %p1097_p11 = scmp.ne.s32.totalorder %s1270_s22, %s1096_s17  ;;  %p1105_p1 = scmp.lt.s32.totalorder %s1096_s17, %s1096_s17 }
  0x25   : > { %p1099_p12 = pnand %p1097_p11, %p1276_p6  ;;  %p1106_p4 = por %p1105_p1, %p1104_p0 }
  0x27   : > { %p1100_p13 = pneg %p1099_p12 }
  0x29   : > { %p1107_p7 = pnand %p1106_p4, %p1100_p13 }
  0x2b   : > { %1110 = shalt.err (!%p1107_p7)
}
  0x2c   : > { %995 = dma.hbm_to_vmem [thread:$0]  (!%p1266_p5), %s1481_s1, 512, %s1270_s22, [#allocation3], %s1187_s27, %s1187_s27, %s1188_s28  }
  0x2d   : > { %s1122_s19 = scalar_lea.vmem %s317_s24, 768  ;;  %p1130_p11 = scmp.lt.s32.totalorder %s317_s24, %s317_s24 }
  0x2e   : > { %p1123_p8 = scmp.ne.s32.totalorder %s317_s24, %s1122_s19  ;;  %p1131_p12 = scmp.lt.s32.totalorder %s1122_s19, %s1122_s19 }
  0x30   : > { %p1125_p9 = pnand %p1123_p8, %p1276_p6  ;;  %p1132_p13 = por %p1131_p12, %p1130_p11 }
  0x32   : > { %p1126_p10 = pneg %p1125_p9 }
  0x34   : > { %p1133_p0 = pnand %p1132_p13, %p1126_p10 }
  0x36   : > { %1136 = shalt.err (!%p1133_p0)
}
  0x37   : > { %1001 = dma.hbm_to_vmem [thread:$0]  (!%p1266_p5), %s1486_s6, 768, %s317_s24, [#allocation5], %s1187_s27, %s1187_s27, %s1188_s28  }
  0x38   : > { %s1189_s22 = smov [#allocation9]  }
  0x39   : > { %s342_s29 = sshll.u32 %s1189_s22, 4  ;;  %s343_s29 = int_to_ptr.vmem [resolvable:$true] %s342_s29 }
  0x3a   : > { %s1148_s30 = scalar_lea.vmem %s343_s29, 768  ;;  %p1156_p8 = scmp.lt.s32.totalorder %s343_s29, %s343_s29 }
  0x3b   : > { %p1149_p1 = scmp.ne.s32.totalorder %s343_s29, %s1148_s30  ;;  %p1157_p9 = scmp.lt.s32.totalorder %s1148_s30, %s1148_s30 }
  0x3d   : > { %p1151_p4 = pnand %p1149_p1, %p1276_p6  ;;  %p1158_p10 = por %p1157_p9, %p1156_p8 }
  0x3f   : > { %p1152_p7 = pneg %p1151_p4 }
  0x41   : > { %p1159_p11 = pnand %p1158_p10, %p1152_p7 }
  0x43   : > { %1162 = shalt.err (!%p1159_p11)
}
  0x44   : > { %1007 = dma.hbm_to_vmem [thread:$0]  (!%p1266_p5), %s1488_s8, 768, %s343_s29, [#allocation8], %s1187_s27, %s1187_s27, %s1188_s28  }
  0x45   : > { %369 = sbr.rel (%p1256_p3) target bundleno = 509 (0x1fd), region = 60 }
  0x4a   : > { %1168 = dma.done.wait (%p1008_p2), [#allocation3], 512  }
  0x4b   : > { %1170 = vsyncadd (%p1008_p2), [#allocation3], 4294966784 }
  0x4c   : > { %1172 = dma.done.wait (%p1008_p2), [#allocation5], 1536  }
  0x4d   : > { %1174 = vsyncadd (%p1008_p2), [#allocation5], 4294965760 }
  0x4e   : > { %1176 = dma.done.wait (%p1008_p2), [#allocation8], 1536  }
  0x4f   : > { %1178 = vsyncadd (%p1008_p2), [#allocation8], 4294965760  ;;  %p423_p3 = scmp.lt.s32.totalorder %s1251_s14, 1  ;;  %vm443_vm0 = vcmask 261120   ;;  %v442_v0 = vld [vmem:[#allocation2 + $0x18] sm:$0xff]  ;;  %v441_v1 = vld [vmem:[#allocation2 + $0x10] sm:$0xff] }
  0x50   : > { %933 = vmatprep.subr.mxu0 %v442_v0  ;;  %v440_v3 = vld [vmem:[#allocation2 + $0x8] sm:$0xff]  ;;  %v439_v4 = vld [vmem:[#allocation2] sm:$0xff]  ;;  %v581_v14 = vld [vmem:[#allocation6] sm:$0xff]  ;;  %vm635_vm1 = vcmask 392192  }
  0x51   : > { %s1495_s14 = smov (!%p423_p3, %s1251_s14), 1  ;;  %934 = vmatpush3.msra.mxu0 %v442_v0  ;;  %v557_v10 = vld [vmem:[%s1482_s2] sm:$0xff]  ;;  %v623_v21 = vld [vmem:[#allocation9] sm:$0xff]  ;;  %v558_v24 = vld [vmem:[%s1482_s2 + $0x8] sm:$0xff] }
  0x52   : > { %s971_s15 = smul.u32 48, %s1495_s14  ;;  %935 = vmatprep.subr.mxu0 %v441_v1  ;;  %v563_v11 = vld [vmem:[#allocation4] sm:$0xff]  ;;  %v564_v25 = vld [vmem:[#allocation4 + $0x8] sm:$0xff]  ;;  %v582_v27 = vld [vmem:[#allocation6 + $0x8] sm:$0xff] }
  0x53   : > { %936 = vmatpush3.msra.mxu0 %v441_v1  ;;  %v575_v12 = vld [vmem:[%s1483_s3] sm:$0xff]  ;;  %v569_v13 = vmul.f32 %v563_v11, %v557_v10  ;;  %v576_v26 = vld [vmem:[%s1483_s3 + $0x8] sm:$0xff]  ;;  %v559_v29 = vld [vmem:[%s1482_s2 + $0x10] sm:$0xff]  ;;  %v570_v34 = vmul.f32 %v564_v25, %v558_v24 }
  0x54   : > { %s427_s27 = scalar_lea.vmem %s1480_s0, %s971_s15  ;;  %937 = vmatprep.subr.mxu0 %v440_v3  ;;  %v587_v15 = vmul.f32 %v581_v14, %v575_v12  ;;  %v599_v16 = vld [vmem:[%s1484_s4] sm:$0xff]  ;;  %v565_v30 = vld [vmem:[#allocation4 + $0x10] sm:$0xff]  ;;  %v588_v35 = vmul.f32 %v582_v27, %v576_v26  ;;  %v600_v36 = vld [vmem:[%s1484_s4 + $0x8] sm:$0xff]  ;;  %s432_s19 = scalar_lea.vmem %s1490_s10, %s971_s15 }
  0x55   : > { %v1365_v2 = vld [vmem:[%s427_s27] sm:$0xff]  ;;  %938 = vmatpush3.msra.mxu0 %v440_v3  ;;  %v1369_v5 = vld [vmem:[%s427_s27 + $0x8] sm:$0xff]  ;;  %v1371_v6 = vld [vmem:[%s427_s27 + $0x10] sm:$0xff]  ;;  %v571_v43 = vmul.f32 %v565_v30, %v559_v29 }
  0x56   : > { %941 = vmatprep.mubr.msk.f32.mxu0 %vm443_vm0, %v1365_v2  ;;  %939 = vmatprep.subr.mxu0 %v439_v4  ;;  %v1377_v7 = vld [vmem:[%s427_s27 + $0x18] sm:$0xff]  ;;  %v1379_v8 = vld [vmem:[%s427_s27 + $0x20] sm:$0xff]  ;;  %v1385_v9 = vld [vmem:[%s427_s27 + $0x28] sm:$0xff]  ;;  %v593_v19 = vadd.f32 %v587_v15, %v569_v13  ;;  %v594_v52 = vadd.f32 %v588_v35, %v570_v34 }
  0x57   : > { %940 = vmatpush3.msra.mxu0 %v439_v4  ;;  %v605_v17 = vld [vmem:[#allocation7] sm:$0xff]  ;;  %v577_v31 = vld [vmem:[%s1483_s3 + $0x10] sm:$0xff]  ;;  %v606_v37 = vld [vmem:[#allocation7 + $0x8] sm:$0xff] }
  0x58   : > { %942 = vmatmul.mubr.msk.f32.vlgmr.msra.gmra.mxu0 %vm443_vm0, %v1369_v5  ;;  %v611_v18 = vmul.f32 %v605_v17, %v599_v16  ;;  %v583_v32 = vld [vmem:[#allocation6 + $0x10] sm:$0xff]  ;;  %v560_v38 = vld [vmem:[%s1482_s2 + $0x18] sm:$0xff]  ;;  %v601_v39 = vld [vmem:[%s1484_s4 + $0x10] sm:$0xff]  ;;  %v612_v53 = vmul.f32 %v606_v37, %v600_v36 }
  0x59   : > { %944 = vmatprep.mubr.msk.f32.mxu0 %vm443_vm0, %v1371_v6  ;;  %v607_v40 = vld [vmem:[#allocation7 + $0x10] sm:$0xff]  ;;  %v566_v41 = vld [vmem:[#allocation4 + $0x18] sm:$0xff]  ;;  %v589_v44 = vmul.f32 %v583_v32, %v577_v31  ;;  %v584_v46 = vld [vmem:[#allocation6 + $0x18] sm:$0xff] }
  0x5a   : > { %v617_v20 = vadd.f32 %v611_v18, %v593_v19  ;;  %v578_v45 = vld [vmem:[%s1483_s3 + $0x18] sm:$0xff]  ;;  %v561_v47 = vld [vmem:[%s1482_s2 + $0x20] sm:$0xff]  ;;  %v585_v50 = vld [vmem:[#allocation6 + $0x20] sm:$0xff]  ;;  %v572_v54 = vmul.f32 %v566_v41, %v560_v38  ;;  %v613_v61 = vmul.f32 %v607_v40, %v601_v39  ;;  %v618_v11 = vadd.f32 %v612_v53, %v594_v52 }
  0x5b   : > { %v567_v48 = vld [vmem:[#allocation4 + $0x20] sm:$0xff]  ;;  %v590_v55 = vmul.f32 %v584_v46, %v578_v45  ;;  %v602_v56 = vld [vmem:[%s1484_s4 + $0x18] sm:$0xff]  ;;  %v562_v58 = vld [vmem:[%s1482_s2 + $0x28] sm:$0xff]  ;;  %v595_v60 = vadd.f32 %v589_v44, %v571_v43 }
  0x5c   : > { %945 = vmatmul.mubr.msk.f32.gmra.mxu0 %vm443_vm0, %v1377_v7  ;;  %v629_v22 = vadd.f32 %v623_v21, %v617_v20  ;;  %v579_v49 = vld [vmem:[%s1483_s3 + $0x20] sm:$0xff]  ;;  %v608_v57 = vld [vmem:[#allocation7 + $0x18] sm:$0xff]  ;;  %v573_v62 = vmul.f32 %v567_v48, %v561_v47  ;;  %v568_v0 = vld [vmem:[#allocation4 + $0x28] sm:$0xff] }
  0x5d   : > { %947 = vmatprep.mubr.msk.f32.mxu0 %vm443_vm0, %v1379_v8  ;;  %v591_v63 = vmul.f32 %v585_v50, %v579_v49  ;;  %v580_v1 = vld [vmem:[%s1483_s3 + $0x28] sm:$0xff]  ;;  %v586_v3 = vld [vmem:[#allocation6 + $0x28] sm:$0xff]  ;;  %v603_v4 = vld [vmem:[%s1484_s4 + $0x20] sm:$0xff]  ;;  %v596_v12 = vadd.f32 %v590_v55, %v572_v54  ;;  %v614_v13 = vmul.f32 %v608_v57, %v602_v56  ;;  %v574_v14 = vmul.f32 %v568_v0, %v562_v58 }
  0x5e   : > { %962 = vmatprep.mubr.msk.f32.mxu1 %vm635_vm1, %v629_v22  ;;  %v609_v10 = vld [vmem:[#allocation7 + $0x20] sm:$0xff]  ;;  %v592_v15 = vmul.f32 %v586_v3, %v580_v1  ;;  %v624_v16 = vld [vmem:[#allocation9 + $0x8] sm:$0xff]  ;;  %v619_v17 = vadd.f32 %v613_v61, %v595_v60  ;;  %v604_v20 = vld [vmem:[%s1484_s4 + $0x28] sm:$0xff] }
  0x5f   : > { %v597_v18 = vadd.f32 %v591_v63, %v573_v62  ;;  %v615_v19 = vmul.f32 %v609_v10, %v603_v4  ;;  %v610_v21 = vld [vmem:[#allocation7 + $0x28] sm:$0xff]  ;;  %v625_v22 = vld [vmem:[#allocation9 + $0x10] sm:$0xff]  ;;  %v630_v24 = vadd.f32 %v624_v16, %v618_v11  ;;  %v620_v25 = vadd.f32 %v614_v13, %v596_v12  ;;  %v627_v32 = vld [vmem:[#allocation9 + $0x20] sm:$0xff] }
  0x60   : > { %948 = vmatmul.mubr.msk.f32.gmra.mxu0 %vm443_vm0, %v1385_v9  ;;  %v598_v26 = vadd.f32 %v592_v15, %v574_v14  ;;  %v616_v27 = vmul.f32 %v610_v21, %v604_v20  ;;  %v631_v29 = vadd.f32 %v625_v22, %v619_v17  ;;  %v626_v30 = vld [vmem:[#allocation9 + $0x18] sm:$0xff]  ;;  %v628_v36 = vld [vmem:[#allocation9 + $0x28] sm:$0xff] }
  0x61   : > { %v621_v31 = vadd.f32 %v615_v19, %v597_v18 }
  0x62   : > { %v622_v34 = vadd.f32 %v616_v27, %v598_v26 }
  0x63   : > { %v633_v35 = vadd.f32 %v627_v32, %v621_v31 }
 0x118   : > { %v1399_v23 = vpop.f32.mrf.mxu0 }
 0x11a   : > { %v1407_v28 = vpop.f32.mrf.mxu0 }
 0x11c   : > { %v946_v33 = vpop.f32.mrf.mxu0 }
 0x11e   : > { %v538_v42 = vpop.f32.mrf.mxu0 }
 0x120   : > { %v949_v51 = vpop.f32.mrf.mxu0 }
 0x121   : > { %950 = vmatprep.subr.mxu1 %v949_v51 }
 0x122   : > { %v548_v59 = vpop.f32.mrf.mxu0  ;;  %951 = vmatpush3.msra.mxu1 %v949_v51 }
 0x123   : > { %952 = vmatprep.subr.mxu1 %v548_v59 }
 0x124   : > { %953 = vmatpush3.msra.mxu1 %v548_v59 }
 0x125   : > { %954 = vmatprep.subr.mxu1 %v946_v33 }
 0x126   : > { %955 = vmatpush3.msra.mxu1 %v946_v33  ;;  %v632_v33 = vadd.f32 %v626_v30, %v620_v25 }
 0x127   : > { %956 = vmatprep.subr.mxu1 %v538_v42 }
 0x128   : > { %957 = vmatpush3.msra.mxu1 %v538_v42 }
 0x129   : > { %958 = vmatprep.subr.mxu1 %v1399_v23 }
 0x12a   : > { %959 = vmatpush3.msra.mxu1 %v1399_v23  ;;  %v634_v23 = vadd.f32 %v628_v36, %v622_v34 }
 0x12b   : > { %960 = vmatprep.subr.mxu1 %v1407_v28 }
 0x12c   : > { %961 = vmatpush3.msra.mxu1 %v1407_v28  ;;  %v908_v28 = vld [vmem:[%s1489_s9] ss:$0 sm:$0xff] }
 0x12d   : > { %963 = vmatmul.mubr.msk.f32.vlgmr.msra.gmra.mxu1 %vm635_vm1, %v630_v24 }
 0x12e   : > { %965 = vmatprep.mubr.msk.f32.mxu1 %vm635_vm1, %v631_v29 }
 0x131   : > { %966 = vmatmul.mubr.msk.f32.gmra.mxu1 %vm635_vm1, %v632_v33 }
 0x132   : > { %968 = vmatprep.mubr.msk.f32.mxu1 %vm635_vm1, %v633_v35 }
 0x135   : > { %969 = vmatmul.mubr.msk.f32.gmra.mxu1 %vm635_vm1, %v634_v23 }
 0x1ed   : > { %v964_v37 = vpop.f32.mrf.mxu1 }
 0x1ee   : > { %v750_v38 = vadd.f32 %v964_v37, %v1369_v5 }
 0x1ef   : > { %v720_v39 = vpop.f32.mrf.mxu1 }
 0x1f0   : > { %v763_v40 = vadd.f32 %v908_v28, %v750_v38  ;;  %v749_v41 = vadd.f32 %v720_v39, %v1365_v2 }
 0x1f1   : > { %v967_v42 = vpop.f32.mrf.mxu1 }
 0x1f2   : > { %769 = vst.msk [vmem:[%s432_s19 + $0x8] sm:$0xff] %vm443_vm0, %v763_v40  ;;  %v762_v43 = vadd.f32 %v908_v28, %v749_v41  ;;  %v752_v44 = vadd.f32 %v967_v42, %v1377_v7 }
 0x1f3   : > { %v730_v45 = vpop.f32.mrf.mxu1 }
 0x1f4   : > { %768 = vst.msk [vmem:[%s432_s19] sm:$0xff] %vm443_vm0, %v762_v43  ;;  %v765_v46 = vadd.f32 %v908_v28, %v752_v44  ;;  %v751_v5 = vadd.f32 %v730_v45, %v1371_v6 }
 0x1f5   : > { %v970_v47 = vpop.f32.mrf.mxu1 }
 0x1f6   : > { %771 = vst.msk [vmem:[%s432_s19 + $0x18] sm:$0xff] %vm443_vm0, %v765_v46  ;;  %v764_v48 = vadd.f32 %v908_v28, %v751_v5  ;;  %v754_v49 = vadd.f32 %v970_v47, %v1385_v9 }
 0x1f7   : > { %v740_v50 = vpop.f32.mrf.mxu1 }
 0x1f8   : > { %770 = vst.msk [vmem:[%s432_s19 + $0x10] sm:$0xff] %vm443_vm0, %v764_v48  ;;  %v767_v2 = vadd.f32 %v908_v28, %v754_v49  ;;  %v753_v51 = vadd.f32 %v740_v50, %v1379_v8 }
 0x1fa   : > { %773 = vst.msk [vmem:[%s432_s19 + $0x28] sm:$0xff] %vm443_vm0, %v767_v2  ;;  %v766_v7 = vadd.f32 %v908_v28, %v753_v51 }
 0x1fc   : > { %772 = vst.msk [vmem:[%s432_s19 + $0x20] sm:$0xff] %vm443_vm0, %v766_v7 }
 0x1fd PF: > { %s23_s13 = sadd.s32 1, %s1181_s13  }
 0x1fe   : > { %p20_p2 = scmp.ge.s32.totalorder %s23_s13, 4  }
 0x200   :  { %22 = sbr.rel (!%p20_p2) target bundleno = 3 (0x3), region = 111 }
 0x205   :  { %795 = vsyncpa [#allocation3], 1 }
 0x206   :  { %797 = vsyncpa [#allocation3 + $0x1], 1 }
 0x207   :  { %798 = vsyncpa [#allocation5], 1 }
 0x208   :  { %799 = vsyncpa [#allocation8], 1 }

</bundles_post_ra>
